<compile_context>
chip_gen: v6e
topology: v6e:2x2x1
jax: 0.10.0
libtpu: 0.0.40
codegen_flags: <defaults>
</compile_context>

<pallas_src>
import functools

import jax
import jax.numpy as jnp
from jax.experimental import pallas as pl
from jax.experimental.pallas import tpu as pltpu

DELTA = 0.5  # module-level `delta` in the reference file


# ----------------------------------------------------------------------------
# Kernel
# ----------------------------------------------------------------------------
def _drs_kernel(x_ref, o_ref, *, delta):
    """x_ref / o_ref: (1, Ct, H*W) f32 blocks.

    Fused: relu -> per-channel spatial max -> min(x, max * delta).
    """
    x = x_ref[...]
    y = jnp.maximum(x, 0.0)                        # ReLU                 (VPU)
    y_max = jnp.max(y, axis=-1, keepdims=True)     # per-channel max      (XLU)
    o_ref[...] = jnp.minimum(y, y_max * delta)     # suppressor           (VPU)


# ----------------------------------------------------------------------------
# Wrapper
# ----------------------------------------------------------------------------
def _pick_channel_tile(C, HW, itemsize=4, max_block_bytes=4 * 1024 * 1024):
    """Largest channel tile that divides C, is a multiple of 8 (sublane tiling)
    when possible, and keeps one block comfortably inside VMEM (blocks are
    double-buffered for both the input and the output)."""
    if C % 8 != 0:
        return C                                   # full extent is always legal
    budget = max(8, max_block_bytes // (itemsize * HW))
    ct = 8
    for d in range(8, C + 1, 8):
        if C % d == 0 and d <= budget:
            ct = d
    return ct


@functools.partial(jax.jit, static_argnames=("delta",))
def drs_forward(x_nchw, delta=DELTA):
    """DRS.forward for an NCHW input; returns the same shape and dtype."""
    B, C, H, W = x_nchw.shape
    HW = H * W
    orig_dtype = x_nchw.dtype
    x = x_nchw.reshape(B, C, HW).astype(jnp.float32)   # contiguous -> free view

    ct = _pick_channel_tile(C, HW)
    grid = (B, C // ct)
    spec = pl.BlockSpec((1, ct, HW), lambda b, c: (b, c, 0))

    out = pl.pallas_call(
        functools.partial(_drs_kernel, delta=float(delta)),
        out_shape=jax.ShapeDtypeStruct((B, C, HW), jnp.float32),
        grid_spec=pltpu.PrefetchScalarGridSpec(
            num_scalar_prefetch=0,
            grid=grid,
            in_specs=[spec],
            out_specs=spec,
        ),
        compiler_params=pltpu.CompilerParams(
            dimension_semantics=("parallel", "parallel"),
        ),
    )(x)
    return out.reshape(B, C, H, W).astype(orig_dtype)


# ----------------------------------------------------------------------------
# Self-test
# ----------------------------------------------------------------------------
if __name__ == "__main__":
    key = jax.random.PRNGKey(0)
    x = jax.random.normal(key, (2, 4, 16, 16), jnp.float32)   # (B, C, H, W)

    y = drs_forward(x)
    jax.block_until_ready(y)

    # Pure-JAX reference of the PyTorch forward (relu -> global max -> min).
    r = jnp.maximum(x, 0.0)
    r_max = jnp.max(r, axis=(2, 3), keepdims=True)
    ref = jnp.minimum(r, r_max * DELTA)

    assert y.shape == x.shape and y.dtype == x.dtype, (y.shape, y.dtype)
    assert jnp.allclose(y, ref, atol=1e-6, rtol=1e-6), float(
        jnp.max(jnp.abs(y - ref)))
    assert bool(jnp.all(jnp.isfinite(y)))
    print("KERNEL_OK")
</pallas_src>

<mosaic_0001>
module attributes {stable_mosaic.version = 11 : i64} {
  func.func @_drs_kernel(%arg0: i32, %arg1: i32, %arg2: memref<1x4x256xf32, #tpu.memory_space<vmem>>, %arg3: memref<1x4x256xf32, #tpu.memory_space<vmem>>) attributes {dimension_semantics = [#tpu.dimension_semantics<parallel>, #tpu.dimension_semantics<parallel>], iteration_bounds = array<i64: 2, 1>, scalar_prefetch = 0 : i64, scratch_operands = 0 : i64, tpu.core_type = #tpu.core_type<tc>, window_params = [{transform_indices = @transform_0, window_bounds = array<i64: 1, 4, 256>}, {transform_indices = @transform_1, window_bounds = array<i64: 1, 4, 256>}]} {
    %c0 = arith.constant 0 : index
    %c0_0 = arith.constant 0 : index
    %c0_1 = arith.constant 0 : index
    %0 = vector.load %arg2[%c0, %c0_0, %c0_1] : memref<1x4x256xf32, #tpu.memory_space<vmem>>, vector<1x4x256xf32>
    %cst = arith.constant 0.000000e+00 : f32
    %1 = vector.broadcast %cst : f32 to vector<1x4x256xf32>
    %2 = arith.maximumf %0, %1 : vector<1x4x256xf32>
    %cst_2 = arith.constant dense<0xFF800000> : vector<1x4xf32>
    %3 = vector.multi_reduction <maximumf>, %2, %cst_2 [2] : vector<1x4x256xf32> to vector<1x4xf32>
    %4 = vector.shape_cast %3 : vector<1x4xf32> to vector<1x4x1xf32>
    %cst_3 = arith.constant 5.000000e-01 : f32
    %5 = vector.broadcast %cst_3 : f32 to vector<1x4x1xf32>
    %6 = arith.mulf %4, %5 : vector<1x4x1xf32>
    %7 = vector.broadcast %6 : vector<1x4x1xf32> to vector<1x4x256xf32>
    %8 = arith.minimumf %2, %7 : vector<1x4x256xf32>
    %c0_4 = arith.constant 0 : index
    %c0_5 = arith.constant 0 : index
    %c0_6 = arith.constant 0 : index
    %9 = vector.load %arg3[%c0_4, %c0_5, %c0_6] : memref<1x4x256xf32, #tpu.memory_space<vmem>>, vector<1x4x256xf32>
    tpu.vector_store %arg3[%c0_4, %c0_5, %c0_6], %8 {strides = array<i32>} : memref<1x4x256xf32, #tpu.memory_space<vmem>>, vector<1x4x256xf32>,
    return
  }
  func.func @transform_0(%arg0: i32, %arg1: i32) -> (i32, i32, i32) {
    %c0_i32 = arith.constant 0 : i32
    %c0_i32_0 = arith.constant 0 : i32
    return %arg0, %arg1, %c0_i32 : i32, i32, i32
  }
  func.func @transform_1(%arg0: i32, %arg1: i32) -> (i32, i32, i32) {
    %c0_i32 = arith.constant 0 : i32
    %c0_i32_0 = arith.constant 0 : i32
    return %arg0, %arg1, %c0_i32 : i32, i32, i32
  }
}

</mosaic_0001>

<bundles_post_ra>
// kernel: drs_forward.1
= control target key start
LH: loop header
LB: loop body
LE: loop exit
PB: predicated region body
PF: predicated region fallthrough
CT: control target
= control target key end

     0   :  { %s341_s6 = smov 0   ;;  %s343_s7 = smov 0   ;;  %s374_s0 = inlined_call_operand.vmem [shape: f32[2,4,256], index: 0, kind: input, shape index: {}]   ;;  %s375_s1 = inlined_call_operand.vmem [shape: f32[2,4,256], index: 1, kind: output, shape index: {}]  }
   0x1   :  { %s345_s8 = smov 0  }
   0x2 LB: > { %s23_s9 = sadd.s32 1, %s324_s7  ;;  %p272_p0 = scmp.ge.s32.totalorder %s328_s8, 1  ;;  %s328_s8 = sphi %s345_s8, %s11_s8   ;;  %s324_s7 = sphi %s343_s7, %s377_s7   ;;  %s320_s6 = sphi %s341_s6, %s376_s6  }
   0x3   : > { %p25_p1 = scmp.ge.s32.totalorder %s23_s9, 2  ;;  %p107_p2 = scmp.lt.s32.totalorder %s328_s8, 3 }
   0x5   : > { %s379_s9 = smov (%p25_p1, %s23_s9), 0  ;;  %p108_p3 = pnand %p272_p0, %p107_p2 }
   0x6   : > { %p135_p4 = scmp.lt.s32.totalorder (!%p108_p3), %s320_s6, 1 }
   0x7   : > { %111 = sbr.rel (%p108_p3) target bundleno = 168 (0xa8), region = 24 }
   0xc   : > { %s381_s6 = smov (!%p135_p4, %s320_s6), 1  ;;  %vm158_vm0 = vcmask 1043456   ;;  %v330_v6 = vmov 839922192   ;;  %v169_v8 = vlaneseq }
   0xd   : > { %s279_s10 = sshll.u32 %s381_s6, 3  ;;  %v167_v7 = vunpack.c.l.s4 %v330_v6 }
   0xe   : > { %s143_s13 = scalar_lea.vmem %s374_s0, %s279_s10  ;;  %v170_v10 = vshrl.u32 %v169_v8, 7  ;;  %s152_s16 = scalar_lea.vmem %s375_s1, %s279_s10 }
   0xf   : > { %v153_v0 = vld [vmem:[%s143_s13] sm:$0xff]  ;;  %v168_v9 = vunpack.c.0.s8 %v167_v7 }
  0x10   : > { %v154_v1 = vmax.f32 %v153_v0, 0.0 }
  0x11   : > { %v171_v11 = vsub.s32 %v168_v9, %v170_v10 }
  0x12   : > { %v156_v2 = vcombine.high %v154_v1, %v154_v1  ;;  %v159_v3 = vsel %vm158_vm0, %v154_v1, -inf }
  0x14   : > { %v160_v4 = vsel %vm158_vm0, %v156_v2, -inf }
  0x15   : > { %v161_v5 = vmax.f32 %v159_v3, %v160_v4 }
  0x17   : > { %162 = vmax.xlane.f32.xlu0 %v161_v5 }
  0xa0   : > { %v163_v12 = vpop.xlane.xlu0 %162 }
  0xa1   : > { %v164_v13 = vmul.f32 0.5, %v163_v12 }
  0xa3   : > { %v172_v14 = vrot.slane %v164_v13, %v171_v11 }
  0xa5   : > { %v174_v15 = vmin.f32 %v154_v1, %v172_v14 }
  0xa7   : > { %175 = vst [vmem:[%s152_s16] sm:$0xff] %v174_v15 }
  0xa8 PF: > { %s11_s8 = sadd.s32 1, %s328_s8   ;;  %s376_s6 = smov %s324_s7 }
  0xa9   : > { %p8_p5 = scmp.ge.s32.totalorder %s11_s8, 4   ;;  %s377_s7 = smov %s379_s9 }
  0xab   :  { %10 = sbr.rel (!%p8_p5) target bundleno = 2 (0x2), region = 54 }

</bundles_post_ra>
